<compile_context>
chip_gen: v6e
topology: v6e:2x2x1
jax: 0.10.0
libtpu: 0.0.40
codegen_flags: <defaults>
</compile_context>

<pallas_src>
import jax
import jax.numpy as jnp
from jax.experimental import pallas as pl
from jax.experimental.pallas import tpu as pltpu

_BN_EPS = 1e-5


def _batchnorm_fused(h, gamma, beta, eps=_BN_EPS):
    """Training-mode BatchNorm1d as a one-pass folded affine.

    mu and E[h^2] are computed in a single pass over h; variance is the biased
    batch variance E[h^2] - mu^2 (matches PyTorch training-mode BN).
    """
    mu = jnp.mean(h, axis=0, keepdims=True)
    ms = jnp.mean(h * h, axis=0, keepdims=True)
    var = ms - mu * mu
    s = gamma * jax.lax.rsqrt(var + eps)
    t = beta - mu * s
    return h * s + t


def actor_kernel(x_ref, vec_ref, w1_ref, w2_ref, w3_ref, o_ref):
    # Static feature sizes from the (static) ref shapes.
    S = x_ref.shape[1]
    F1 = w1_ref.shape[1]
    F2 = w2_ref.shape[1]
    A = w3_ref.shape[1]

    # Unpack the per-feature vectors (static slices of the packed operand).
    g0 = vec_ref[0:1, 0:S]
    b0 = vec_ref[1:2, 0:S]
    g1 = vec_ref[2:3, 0:F1]
    b1 = vec_ref[3:4, 0:F1]
    g2 = vec_ref[4:5, 0:F2]
    b2 = vec_ref[5:6, 0:F2]
    c3 = vec_ref[6:7, 0:A]

    x = x_ref[...].astype(jnp.float32)

    # bn0(state)
    x = _batchnorm_fused(x, g0, b0)

    # relu(bn1(fc1(x)))  -- fc1 bias dropped: constant shift before BN is a no-op
    h1 = jnp.dot(x, w1_ref[...], preferred_element_type=jnp.float32)
    h1 = jnp.maximum(_batchnorm_fused(h1, g1, b1), 0.0)

    # relu(bn2(fc2(h1))) -- fc2 bias dropped for the same reason
    h2 = jnp.dot(h1, w2_ref[...], preferred_element_type=jnp.float32)
    h2 = jnp.maximum(_batchnorm_fused(h2, g2, b2), 0.0)

    # tanh(fc3(h2))
    h3 = jnp.dot(h2, w3_ref[...], preferred_element_type=jnp.float32) + c3
    o_ref[...] = jnp.tanh(h3).astype(o_ref.dtype)


@jax.jit
def actor_forward(state, params):
    batch, state_size = state.shape
    fc1_units = params["w1"].shape[1]
    fc2_units = params["w2"].shape[1]
    action_size = params["w3"].shape[1]

    operands = (state, params["vecs"], params["w1"], params["w2"], params["w3"])
    vmem_spec = pl.BlockSpec(memory_space=pltpu.MemorySpace.VMEM)

    flops = 2 * batch * (state_size * fc1_units
                         + fc1_units * fc2_units
                         + fc2_units * action_size)
    transcendentals = batch * action_size + (state_size + fc1_units + fc2_units)
    bytes_accessed = 4 * (batch * state_size
                          + params["vecs"].size
                          + state_size * fc1_units
                          + fc1_units * fc2_units
                          + fc2_units * action_size
                          + batch * action_size)

    return pl.pallas_call(
        actor_kernel,
        out_shape=jax.ShapeDtypeStruct((batch, action_size), jnp.float32),
        in_specs=[vmem_spec] * len(operands),
        out_specs=vmem_spec,
        cost_estimate=pl.CostEstimate(
            flops=flops,
            transcendentals=transcendentals,
            bytes_accessed=bytes_accessed,
        ),
    )(*operands)


def init_actor_params(key, state_size, action_size, fc1_units, fc2_units):
    """Deterministic synthetic init mirroring Actor.__init__ shapes.

    PyTorch Linear weight is (out, in); we store the transpose (in, out) so the
    kernel computes x @ W directly. Uniform ranges follow reset_parameters().
    The nine small per-feature vectors are packed into one (8, Cmax) operand
    for the kernel; c1/c2 are kept separately ONLY for the reference check.
    """
    ks = jax.random.split(key, 6)

    def uni(k, shape, lim):
        return jax.random.uniform(k, shape, jnp.float32, -lim, lim)

    lim1 = 1.0 / jnp.sqrt(jnp.float32(fc1_units))   # get_range uses weight.size()[0]
    lim2 = 1.0 / jnp.sqrt(jnp.float32(fc2_units))

    g0 = jnp.ones((state_size,), jnp.float32)
    b0 = jnp.zeros((state_size,), jnp.float32)
    g1 = jnp.ones((fc1_units,), jnp.float32)
    b1 = jnp.zeros((fc1_units,), jnp.float32)
    g2 = jnp.ones((fc2_units,), jnp.float32)
    b2 = jnp.zeros((fc2_units,), jnp.float32)
    c3 = uni(ks[5], (action_size,), 1.0 / jnp.sqrt(jnp.float32(fc2_units)))

    cmax = max(state_size, fc1_units, fc2_units, action_size)
    vecs = jnp.zeros((8, cmax), jnp.float32)
    vecs = vecs.at[0, :state_size].set(g0)
    vecs = vecs.at[1, :state_size].set(b0)
    vecs = vecs.at[2, :fc1_units].set(g1)
    vecs = vecs.at[3, :fc1_units].set(b1)
    vecs = vecs.at[4, :fc2_units].set(g2)
    vecs = vecs.at[5, :fc2_units].set(b2)
    vecs = vecs.at[6, :action_size].set(c3)

    params = {
        "vecs": vecs,
        # Linear weights stored as (in, out).
        "w1": uni(ks[0], (state_size, fc1_units), lim1),
        "w2": uni(ks[2], (fc1_units, fc2_units), lim2),
        "w3": uni(ks[4], (fc2_units, action_size), 0.003),
        # fc1/fc2 biases: used only by the reference (no-op before training BN).
        "c1": uni(ks[1], (1, fc1_units), 1.0 / jnp.sqrt(jnp.float32(state_size))),
        "c2": uni(ks[3], (1, fc2_units), 1.0 / jnp.sqrt(jnp.float32(fc1_units))),
    }
    return params


def actor_reference(state, params, eps=_BN_EPS):
    """Pure-JAX reference that mirrors the PyTorch forward exactly
    (two-pass BN, fc1/fc2 biases included)."""
    state_size = state.shape[1]
    fc1_units = params["w1"].shape[1]
    fc2_units = params["w2"].shape[1]
    action_size = params["w3"].shape[1]
    v = params["vecs"]
    g0, b0 = v[0:1, :state_size], v[1:2, :state_size]
    g1, b1 = v[2:3, :fc1_units], v[3:4, :fc1_units]
    g2, b2 = v[4:5, :fc2_units], v[5:6, :fc2_units]
    c3 = v[6:7, :action_size]

    def bn(h, g, b):
        mu = jnp.mean(h, axis=0, keepdims=True)
        var = jnp.mean((h - mu) ** 2, axis=0, keepdims=True)
        return (h - mu) / jnp.sqrt(var + eps) * g + b

    x = bn(state, g0, b0)
    h1 = jax.nn.relu(bn(x @ params["w1"] + params["c1"], g1, b1))
    h2 = jax.nn.relu(bn(h1 @ params["w2"] + params["c2"], g2, b2))
    return jnp.tanh(h2 @ params["w3"] + c3)


if __name__ == "__main__":
    # Small shapes consistent with the module: state -> fc1 -> fc2 -> action.
    batch, state_size, action_size = 8, 32, 8
    fc1_units, fc2_units = 256, 128

    key = jax.random.PRNGKey(0)
    k_params, k_state = jax.random.split(key)
    params = init_actor_params(k_params, state_size, action_size, fc1_units, fc2_units)
    state = jax.random.normal(k_state, (batch, state_size), jnp.float32)

    out = actor_forward(state, params)
    out = jax.block_until_ready(out)

    ref = actor_reference(state, params)
    assert out.shape == (batch, action_size)
    # Tolerance slightly loosened: the kernel's one-pass BN (E[h^2]-mu^2) and
    # dropped pre-BN biases are mathematically equivalent but not bitwise.
    assert jnp.allclose(out, ref, atol=1e-4, rtol=1e-4), "mismatch vs JAX reference"

    print("KERNEL_OK")
</pallas_src>

<mosaic_0001>
module attributes {stable_mosaic.version = 11 : i64} {
  func.func @actor_kernel(%arg0: memref<8x32xf32, #tpu.memory_space<vmem>>, %arg1: memref<8x256xf32, #tpu.memory_space<vmem>>, %arg2: memref<32x256xf32, #tpu.memory_space<vmem>>, %arg3: memref<256x128xf32, #tpu.memory_space<vmem>>, %arg4: memref<128x8xf32, #tpu.memory_space<vmem>>, %arg5: memref<8x8xf32, #tpu.memory_space<vmem>>) attributes {dimension_semantics = [], scalar_prefetch = 0 : i64, scratch_operands = 0 : i64, tpu.core_type = #tpu.core_type<tc>} {
    %c0 = arith.constant 0 : index
    %c0_0 = arith.constant 0 : index
    %0 = vector.load %arg1[%c0, %c0_0] : memref<8x256xf32, #tpu.memory_space<vmem>>, vector<1x32xf32>
    %c1 = arith.constant 1 : index
    %c0_1 = arith.constant 0 : index
    %1 = vector.load %arg1[%c1, %c0_1] : memref<8x256xf32, #tpu.memory_space<vmem>>, vector<1x32xf32>
    %c2 = arith.constant 2 : index
    %c0_2 = arith.constant 0 : index
    %2 = vector.load %arg1[%c2, %c0_2] : memref<8x256xf32, #tpu.memory_space<vmem>>, vector<1x256xf32>
    %c3 = arith.constant 3 : index
    %c0_3 = arith.constant 0 : index
    %3 = vector.load %arg1[%c3, %c0_3] : memref<8x256xf32, #tpu.memory_space<vmem>>, vector<1x256xf32>
    %c4 = arith.constant 4 : index
    %c0_4 = arith.constant 0 : index
    %4 = vector.load %arg1[%c4, %c0_4] : memref<8x256xf32, #tpu.memory_space<vmem>>, vector<1x128xf32>
    %c5 = arith.constant 5 : index
    %c0_5 = arith.constant 0 : index
    %5 = vector.load %arg1[%c5, %c0_5] : memref<8x256xf32, #tpu.memory_space<vmem>>, vector<1x128xf32>
    %c6 = arith.constant 6 : index
    %c0_6 = arith.constant 0 : index
    %6 = vector.load %arg1[%c6, %c0_6] : memref<8x256xf32, #tpu.memory_space<vmem>>, vector<1x8xf32>
    %c0_7 = arith.constant 0 : index
    %c0_8 = arith.constant 0 : index
    %7 = vector.load %arg0[%c0_7, %c0_8] : memref<8x32xf32, #tpu.memory_space<vmem>>, vector<8x32xf32>
    %cst = arith.constant dense<0.000000e+00> : vector<32xf32>
    %8 = vector.multi_reduction <add>, %7, %cst [0] : vector<8x32xf32> to vector<32xf32>
    %9 = vector.shape_cast %8 : vector<32xf32> to vector<1x32xf32>
    %cst_9 = arith.constant 8.000000e+00 : f32
    %10 = vector.broadcast %cst_9 : f32 to vector<1x32xf32>
    %11 = arith.divf %9, %10 : vector<1x32xf32>
    %12 = arith.mulf %7, %7 : vector<8x32xf32>
    %cst_10 = arith.constant dense<0.000000e+00> : vector<32xf32>
    %13 = vector.multi_reduction <add>, %12, %cst_10 [0] : vector<8x32xf32> to vector<32xf32>
    %14 = vector.shape_cast %13 : vector<32xf32> to vector<1x32xf32>
    %cst_11 = arith.constant 8.000000e+00 : f32
    %15 = vector.broadcast %cst_11 : f32 to vector<1x32xf32>
    %16 = arith.divf %14, %15 : vector<1x32xf32>
    %17 = arith.mulf %11, %11 : vector<1x32xf32>
    %18 = arith.subf %16, %17 : vector<1x32xf32>
    %cst_12 = arith.constant 9.99999974E-6 : f32
    %19 = vector.broadcast %cst_12 : f32 to vector<1x32xf32>
    %20 = arith.addf %18, %19 : vector<1x32xf32>
    %21 = math.rsqrt %20 : vector<1x32xf32>
    %22 = arith.mulf %0, %21 : vector<1x32xf32>
    %23 = arith.mulf %11, %22 : vector<1x32xf32>
    %24 = arith.subf %1, %23 : vector<1x32xf32>
    %25 = vector.broadcast %22 : vector<1x32xf32> to vector<8x32xf32>
    %26 = arith.mulf %7, %25 : vector<8x32xf32>
    %27 = vector.broadcast %24 : vector<1x32xf32> to vector<8x32xf32>
    %28 = arith.addf %26, %27 : vector<8x32xf32>
    %c0_13 = arith.constant 0 : index
    %c0_14 = arith.constant 0 : index
    %29 = vector.load %arg2[%c0_13, %c0_14] : memref<32x256xf32, #tpu.memory_space<vmem>>, vector<32x256xf32>
    %cst_15 = arith.constant dense<0.000000e+00> : vector<8x256xf32>
    %30 = tpu.matmul %28, %29, %cst_15 {dimension_numbers = #tpu.dot_dimension_numbers<[1], [0], [0], [1], [0, 0, 1, 1], [], []>} : vector<8x32xf32>, vector<32x256xf32>, vector<8x256xf32> -> vector<8x256xf32>
    %cst_16 = arith.constant dense<0.000000e+00> : vector<256xf32>
    %31 = vector.multi_reduction <add>, %30, %cst_16 [0] : vector<8x256xf32> to vector<256xf32>
    %32 = vector.shape_cast %31 : vector<256xf32> to vector<1x256xf32>
    %cst_17 = arith.constant 8.000000e+00 : f32
    %33 = vector.broadcast %cst_17 : f32 to vector<1x256xf32>
    %34 = arith.divf %32, %33 : vector<1x256xf32>
    %35 = arith.mulf %30, %30 : vector<8x256xf32>
    %cst_18 = arith.constant dense<0.000000e+00> : vector<256xf32>
    %36 = vector.multi_reduction <add>, %35, %cst_18 [0] : vector<8x256xf32> to vector<256xf32>
    %37 = vector.shape_cast %36 : vector<256xf32> to vector<1x256xf32>
    %cst_19 = arith.constant 8.000000e+00 : f32
    %38 = vector.broadcast %cst_19 : f32 to vector<1x256xf32>
    %39 = arith.divf %37, %38 : vector<1x256xf32>
    %40 = arith.mulf %34, %34 : vector<1x256xf32>
    %41 = arith.subf %39, %40 : vector<1x256xf32>
    %cst_20 = arith.constant 9.99999974E-6 : f32
    %42 = vector.broadcast %cst_20 : f32 to vector<1x256xf32>
    %43 = arith.addf %41, %42 : vector<1x256xf32>
    %44 = math.rsqrt %43 : vector<1x256xf32>
    %45 = arith.mulf %2, %44 : vector<1x256xf32>
    %46 = arith.mulf %34, %45 : vector<1x256xf32>
    %47 = arith.subf %3, %46 : vector<1x256xf32>
    %48 = vector.broadcast %45 : vector<1x256xf32> to vector<8x256xf32>
    %49 = arith.mulf %30, %48 : vector<8x256xf32>
    %50 = vector.broadcast %47 : vector<1x256xf32> to vector<8x256xf32>
    %51 = arith.addf %49, %50 : vector<8x256xf32>
    %cst_21 = arith.constant 0.000000e+00 : f32
    %52 = vector.broadcast %cst_21 : f32 to vector<8x256xf32>
    %53 = arith.maximumf %51, %52 : vector<8x256xf32>
    %c0_22 = arith.constant 0 : index
    %c0_23 = arith.constant 0 : index
    %54 = vector.load %arg3[%c0_22, %c0_23] : memref<256x128xf32, #tpu.memory_space<vmem>>, vector<256x128xf32>
    %cst_24 = arith.constant dense<0.000000e+00> : vector<8x128xf32>
    %55 = tpu.matmul %53, %54, %cst_24 {dimension_numbers = #tpu.dot_dimension_numbers<[1], [0], [0], [1], [0, 0, 1, 1], [], []>} : vector<8x256xf32>, vector<256x128xf32>, vector<8x128xf32> -> vector<8x128xf32>
    %cst_25 = arith.constant dense<0.000000e+00> : vector<128xf32>
    %56 = vector.multi_reduction <add>, %55, %cst_25 [0] : vector<8x128xf32> to vector<128xf32>
    %57 = vector.shape_cast %56 : vector<128xf32> to vector<1x128xf32>
    %cst_26 = arith.constant 8.000000e+00 : f32
    %58 = vector.broadcast %cst_26 : f32 to vector<1x128xf32>
    %59 = arith.divf %57, %58 : vector<1x128xf32>
    %60 = arith.mulf %55, %55 : vector<8x128xf32>
    %cst_27 = arith.constant dense<0.000000e+00> : vector<128xf32>
    %61 = vector.multi_reduction <add>, %60, %cst_27 [0] : vector<8x128xf32> to vector<128xf32>
    %62 = vector.shape_cast %61 : vector<128xf32> to vector<1x128xf32>
    %cst_28 = arith.constant 8.000000e+00 : f32
    %63 = vector.broadcast %cst_28 : f32 to vector<1x128xf32>
    %64 = arith.divf %62, %63 : vector<1x128xf32>
    %65 = arith.mulf %59, %59 : vector<1x128xf32>
    %66 = arith.subf %64, %65 : vector<1x128xf32>
    %cst_29 = arith.constant 9.99999974E-6 : f32
    %67 = vector.broadcast %cst_29 : f32 to vector<1x128xf32>
    %68 = arith.addf %66, %67 : vector<1x128xf32>
    %69 = math.rsqrt %68 : vector<1x128xf32>
    %70 = arith.mulf %4, %69 : vector<1x128xf32>
    %71 = arith.mulf %59, %70 : vector<1x128xf32>
    %72 = arith.subf %5, %71 : vector<1x128xf32>
    %73 = vector.broadcast %70 : vector<1x128xf32> to vector<8x128xf32>
    %74 = arith.mulf %55, %73 : vector<8x128xf32>
    %75 = vector.broadcast %72 : vector<1x128xf32> to vector<8x128xf32>
    %76 = arith.addf %74, %75 : vector<8x128xf32>
    %cst_30 = arith.constant 0.000000e+00 : f32
    %77 = vector.broadcast %cst_30 : f32 to vector<8x128xf32>
    %78 = arith.maximumf %76, %77 : vector<8x128xf32>
    %c0_31 = arith.constant 0 : index
    %c0_32 = arith.constant 0 : index
    %79 = vector.load %arg4[%c0_31, %c0_32] : memref<128x8xf32, #tpu.memory_space<vmem>>, vector<128x8xf32>
    %cst_33 = arith.constant dense<0.000000e+00> : vector<8x8xf32>
    %80 = tpu.matmul %78, %79, %cst_33 {dimension_numbers = #tpu.dot_dimension_numbers<[1], [0], [0], [1], [0, 0, 1, 1], [], []>} : vector<8x128xf32>, vector<128x8xf32>, vector<8x8xf32> -> vector<8x8xf32>
    %81 = vector.broadcast %6 : vector<1x8xf32> to vector<8x8xf32>
    %82 = arith.addf %80, %81 : vector<8x8xf32>
    %83 = math.tanh %82 : vector<8x8xf32>
    %c0_34 = arith.constant 0 : index
    %c0_35 = arith.constant 0 : index
    %84 = vector.load %arg5[%c0_34, %c0_35] : memref<8x8xf32, #tpu.memory_space<vmem>>, vector<8x8xf32>
    tpu.vector_store %arg5[%c0_34, %c0_35], %83 {strides = array<i32>} : memref<8x8xf32, #tpu.memory_space<vmem>>, vector<8x8xf32>,
    return
  }
}

</mosaic_0001>

<bundles_post_ra>
// kernel: actor_forward.1
= control target key start
LH: loop header
LB: loop body
LE: loop exit
PB: predicated region body
PF: predicated region fallthrough
CT: control target
= control target key end

     0   :  { %10 = vsyncpa [#allocation3], 0  ;;  %s810_s0 = inlined_call_operand.vmem [shape: f32[8,32], index: 0, kind: input, shape index: {}]   ;;  %s811_s1 = inlined_call_operand.vmem [shape: f32[8,256], index: 1, kind: input, shape index: {}]   ;;  %s812_s2 = inlined_call_operand.vmem [shape: f32[32,256], index: 2, kind: input, shape index: {}]   ;;  %s813_s3 = inlined_call_operand.hbm [shape: f32[256,128], index: 3, kind: input, shape index: {}]   ;;  %s814_s4 = inlined_call_operand.vmem [shape: f32[128,8], index: 4, kind: input, shape index: {}]   ;;  %s815_s5 = inlined_call_operand.hbm [shape: f32[8,8], index: 5, kind: output, shape index: {}]  }
   0x1   :  { %11 = vsyncpa [#allocation4], 0  ;;  %s643_s18 = smov [#allocation2]  }
   0x2   :  { %s23_s19 = sshll.u32 %s643_s18, 4  ;;  %s24_s19 = int_to_ptr.vmem [resolvable:$true] %s23_s19 }
   0x3   :  { %s607_s20 = scalar_lea.vmem %s24_s19, 4096  ;;  %p612_p1 = scmp.lt.s32.totalorder %s24_s19, %s24_s19 }
   0x4   :  { %p608_p0 = scmp.ne.s32.totalorder %s24_s19, %s607_s20  ;;  %p613_p2 = scmp.lt.s32.totalorder %s607_s20, %s607_s20 }
   0x6   :  { %p614_p3 = por %p613_p2, %p612_p1 }
   0x8   :  { %p615_p4 = pnand %p614_p3, %p608_p0 }
   0xa   :  { %618 = shalt.err (!%p615_p4)
}
   0xb   :  { %s644_s21 = smov 128   ;;  %s645_s22 = smov 8  }
   0xc   :  { %29 = dma.hbm_to_vmem [thread:$0]  %s813_s3, 4096, %s24_s19, [#allocation3], %s644_s21, %s644_s21, %s645_s22  }
   0xd   :  { %639 = dma.done.wait [#allocation3], 4096  }
   0xe   :  { %640 = vsyncadd [#allocation3], 4294963200  ;;  %v646_v0 = vmov 0.0   ;;  %v80_v1 = vld [vmem:[%s812_s2 + $0x38] sm:$0xff]  ;;  %v79_v2 = vld [vmem:[%s812_s2 + $0x30] sm:$0xff]  ;;  %vm45_vm0 = vcmask 261120  }
   0xf   :  { %148 = vmatprep.mubr.f32.mxu0 %v646_v0  ;;  %v78_v3 = vld [vmem:[%s812_s2 + $0x28] sm:$0xff]  ;;  %108 = vmatprep.subr.mxu0 %v80_v1  ;;  %v77_v4 = vld [vmem:[%s812_s2 + $0x20] sm:$0xff]  ;;  %v76_v5 = vld [vmem:[%s812_s2 + $0x18] sm:$0xff]  ;;  %vm648_vm1 = vmmov 0   ;;  %s649_s3 = smov [#allocation5]   ;;  %vm475_vm2 = vcmask 64512  }
  0x10   :  { %109 = vmatpush1.msra.mxu0 %v79_v2  ;;  %v75_v6 = vld [vmem:[%s812_s2 + $0x10] sm:$0xff]  ;;  %v44_v7 = vld [vmem:[%s810_s0] sm:$0xff]  ;;  %v74_v8 = vld [vmem:[%s812_s2 + $0x8] sm:$0xff]  ;;  %s483_s7 = sshll.u32 %s649_s3, 4  ;;  %s484_s7 = int_to_ptr.vmem [resolvable:$true] %s483_s7 }
  0x11   :  { %110 = vmatprep.subr.mxu0 %v78_v3  ;;  %v46_v9 = vsel %vm45_vm0, %v44_v7, 0.0  ;;  %v55_v10 = vmul.f32 %v44_v7, %v44_v7  ;;  %v73_v11 = vld [vmem:[%s812_s2] sm:$0xff]  ;;  %v292_v38 = vld [vmem:[#allocation2 + $0xf8] sm:$0xff]  ;;  %v291_v40 = vld [vmem:[#allocation2 + $0xf0] sm:$0xff]  ;;  %s619_s8 = scalar_lea.vmem %s484_s7, 128  ;;  %p624_p6 = scmp.lt.s32.totalorder %s484_s7, %s484_s7 }
  0x12   :  { %111 = vmatpush1.msra.mxu0 %v77_v4  ;;  %v47_v12 = vrot.slane %v46_v9, 4  ;;  %v35_v30 = vld [vmem:[%s811_s1] ss:$0 sm:$0xff]  ;;  %v36_v33 = vld [vmem:[%s811_s1 + $0x1] ss:$0 sm:$0xff]  ;;  %v276_v39 = vld [vmem:[#allocation2 + $0x78] sm:$0xff]  ;;  %495 = vmatprep.subr.mxu1 %v292_v38  ;;  %p620_p5 = scmp.ne.s32.totalorder %s484_s7, %s619_s8  ;;  %p625_p7 = scmp.lt.s32.totalorder %s619_s8, %s619_s8 }
  0x13   :  { %112 = vmatprep.subr.mxu0 %v76_v5  ;;  %v56_v13 = vsel %vm45_vm0, %v55_v10, 0.0  ;;  %v275_v41 = vld [vmem:[#allocation2 + $0x70] sm:$0xff]  ;;  %496 = vmatpush3.msra.mxu1 %v276_v39  ;;  %v290_v42 = vld [vmem:[#allocation2 + $0xe8] sm:$0xff]  ;;  %v289_v44 = vld [vmem:[#allocation2 + $0xe0] sm:$0xff] }
  0x14   :  { %113 = vmatpush1.msra.mxu0 %v75_v6  ;;  %v48_v14 = vadd.f32 %v47_v12, %v46_v9  ;;  %v57_v15 = vrot.slane %v56_v13, 4  ;;  %497 = vmatprep.subr.mxu1 %v291_v40  ;;  %v274_v43 = vld [vmem:[#allocation2 + $0x68] sm:$0xff]  ;;  %v273_v45 = vld [vmem:[#allocation2 + $0x60] sm:$0xff]  ;;  %v288_v46 = vld [vmem:[#allocation2 + $0xd8] sm:$0xff]  ;;  %p626_p8 = por %p625_p7, %p624_p6 }
  0x15   :  { %114 = vmatprep.subr.mxu0 %v74_v8  ;;  %498 = vmatpush3.msra.mxu1 %v275_v41  ;;  %v272_v47 = vld [vmem:[#allocation2 + $0x58] sm:$0xff]  ;;  %v287_v48 = vld [vmem:[#allocation2 + $0xd0] sm:$0xff]  ;;  %v286_v50 = vld [vmem:[#allocation2 + $0xc8] sm:$0xff] }
  0x16   :  { %115 = vmatpush1.msra.mxu0 %v73_v11  ;;  %v49_v16 = vrot.slane %v48_v14, 2  ;;  %v58_v17 = vadd.f32 %v57_v15, %v56_v13  ;;  %499 = vmatprep.subr.mxu1 %v290_v42  ;;  %v271_v49 = vld [vmem:[#allocation2 + $0x50] sm:$0xff]  ;;  %v270_v51 = vld [vmem:[#allocation2 + $0x48] sm:$0xff]  ;;  %v285_v52 = vld [vmem:[#allocation2 + $0xc0] sm:$0xff]  ;;  %p627_p9 = pnand %p626_p8, %p620_p5 }
  0x17   :  { %547 = vmatprep.subr.mxu0 %v646_v0  ;;  %500 = vmatpush3.msra.mxu1 %v274_v43  ;;  %v269_v53 = vld [vmem:[#allocation2 + $0x40] sm:$0xff]  ;;  %v284_v54 = vld [vmem:[#allocation2 + $0xb8] sm:$0xff]  ;;  %v283_v56 = vld [vmem:[#allocation2 + $0xb0] sm:$0xff] }
  0x18   :  { %v50_v18 = vadd.f32 %v49_v16, %v48_v14  ;;  %v59_v19 = vrot.slane %v58_v17, 2  ;;  %501 = vmatprep.subr.mxu1 %v289_v44  ;;  %v268_v55 = vld [vmem:[#allocation2 + $0x38] sm:$0xff]  ;;  %v267_v57 = vld [vmem:[#allocation2 + $0x30] sm:$0xff]  ;;  %v282_v58 = vld [vmem:[#allocation2 + $0xa8] sm:$0xff] }
  0x19   :  { %502 = vmatpush3.msra.mxu1 %v273_v45  ;;  %v266_v59 = vld [vmem:[#allocation2 + $0x28] sm:$0xff]  ;;  %v281_v60 = vld [vmem:[#allocation2 + $0xa0] sm:$0xff]  ;;  %v280_v62 = vld [vmem:[#allocation2 + $0x98] sm:$0xff]  ;;  %v647_v45 = vmov 1966171168  }
  0x1a   :  { %v51_v20 = vrot.slane %v50_v18, 1  ;;  %v60_v21 = vadd.f32 %v59_v19, %v58_v17  ;;  %503 = vmatprep.subr.mxu1 %v288_v46  ;;  %v265_v61 = vld [vmem:[#allocation2 + $0x20] sm:$0xff]  ;;  %v264_v63 = vld [vmem:[#allocation2 + $0x18] sm:$0xff]  ;;  %v279_v1 = vld [vmem:[#allocation2 + $0x90] sm:$0xff]  ;;  %v197_v46 = vunpack.c.l.s4 %v647_v45 }
  0x1b   :  { %504 = vmatpush3.msra.mxu1 %v272_v47  ;;  %v263_v2 = vld [vmem:[#allocation2 + $0x10] sm:$0xff]  ;;  %v278_v3 = vld [vmem:[#allocation2 + $0x88] sm:$0xff]  ;;  %v277_v5 = vld [vmem:[#allocation2 + $0x80] sm:$0xff]  ;;  %v199_v47 = vlaneseq }
  0x1c   :  { %v52_v22 = vadd.f32 %v51_v20, %v50_v18  ;;  %v61_v23 = vrot.slane %v60_v21, 1  ;;  %505 = vmatprep.subr.mxu1 %v287_v48  ;;  %v262_v4 = vld [vmem:[#allocation2 + $0x8] sm:$0xff]  ;;  %v261_v6 = vld [vmem:[#allocation2] sm:$0xff]  ;;  %v198_v48 = vunpack.c.0.s8 %v197_v46 }
  0x1d   :  { %506 = vmatpush3.msra.mxu1 %v271_v49  ;;  %v200_v49 = vshrl.u32 %v199_v47, 7 }
  0x1e   :  { %v54_v24 = vmul.f32 0.125, %v52_v22  ;;  %v62_v25 = vadd.f32 %v61_v23, %v60_v21  ;;  %507 = vmatprep.subr.mxu1 %v286_v50 }
  0x1f   :  { %508 = vmatpush3.msra.mxu1 %v270_v51  ;;  %v201_v51 = vsub.s32 %v198_v48, %v200_v49 }
  0x20   :  { %v63_v26 = vmul.f32 0.125, %v62_v25  ;;  %v64_v27 = vmul.f32 %v54_v24, %v54_v24  ;;  %509 = vmatprep.subr.mxu1 %v285_v52 }
  0x21   :  { %510 = vmatpush3.msra.mxu1 %v269_v53 }
  0x22   :  { %v65_v28 = vsub.f32 %v63_v26, %v64_v27  ;;  %511 = vmatprep.subr.mxu1 %v284_v54 }
  0x23   :  { %512 = vmatpush3.msra.mxu1 %v268_v55  ;;  %v492_v55 = vld [vmem:[%s811_s1 + $0x2] ss:$8 sm:$0x3] }
  0x24   :  { %v66_v29 = vadd.f32 1e-05, %v65_v28  ;;  %513 = vmatprep.subr.mxu1 %v283_v56 }
  0x25   :  { %514 = vmatpush3.msra.mxu1 %v267_v57  ;;  %v215_v57 = vsub.s32 0, %v200_v49 }
  0x26   :  { %589 = vrsqrt.f32 %v66_v29  ;;  %515 = vmatprep.subr.mxu1 %v282_v58  ;;  %v219_v58 = vsub.s32 1, %v200_v49 }
  0x27   :  { %516 = vmatpush3.msra.mxu1 %v266_v59 }
  0x28   :  { %517 = vmatprep.subr.mxu1 %v281_v60 }
  0x29   :  { %518 = vmatpush3.msra.mxu1 %v265_v61 }
  0x2a   :  { %519 = vmatprep.subr.mxu1 %v280_v62 }
  0x2b   :  { %520 = vmatpush3.msra.mxu1 %v264_v63 }
  0x2c   :  { %521 = vmatprep.subr.mxu1 %v279_v1 }
  0x2d   :  { %522 = vmatpush3.msra.mxu1 %v263_v2 }
  0x2e   :  { %523 = vmatprep.subr.mxu1 %v278_v3  ;;  %v493_v3 = vld [vmem:[%s811_s1 + $0x3] ss:$8 sm:$0x3] }
  0x2f   :  { %524 = vmatpush3.msra.mxu1 %v262_v4 }
  0x30   :  { %525 = vmatprep.subr.mxu1 %v277_v5 }
  0x31   :  { %526 = vmatpush3.msra.mxu1 %v261_v6 }
  0x33   :  { %v590_v31 = vpop.eup %589 }
  0x34   :  { %v68_v32 = vmul.f32 %v590_v31, %v35_v30 }
  0x36   :  { %v69_v34 = vmul.f32 %v68_v32, %v54_v24  ;;  %v71_v35 = vmul.f32 %v68_v32, %v44_v7 }
  0x38   :  { %v70_v36 = vsub.f32 %v36_v33, %v69_v34 }
  0x3a   :  { %v72_v37 = vadd.f32 %v71_v35, %v70_v36 }
  0x3c   :  { %494 = vmatmul.mubr.msk.f32.vlgmr.msra.gmra.mxu0 %vm45_vm0, %v72_v37 }
  0x3d   :  { %579 = vmatprep.mubr.msk.f32.mxu0 %vm648_vm1, %v646_v0 }
  0xfc   :  { %v721_v7 = vpop.f32.mrf.mxu0 }
  0xfd   :  { %v155_v8 = vrot.slane %v721_v7, 4  ;;  %v169_v9 = vmul.f32 %v721_v7, %v721_v7 }
  0xfe   :  { %v152_v10 = vpop.f32.mrf.mxu0 }
  0xff   :  { %v156_v11 = vadd.f32 %v155_v8, %v721_v7  ;;  %v171_v12 = vrot.slane %v169_v9, 4  ;;  %v161_v13 = vrot.slane %v152_v10, 4  ;;  %v170_v14 = vmul.f32 %v152_v10, %v152_v10 }
 0x101   :  { %v157_v15 = vrot.slane %v156_v11, 2  ;;  %v172_v16 = vadd.f32 %v171_v12, %v169_v9  ;;  %v162_v17 = vadd.f32 %v161_v13, %v152_v10  ;;  %v177_v18 = vrot.slane %v170_v14, 4 }
 0x103   :  { %v158_v19 = vadd.f32 %v157_v15, %v156_v11  ;;  %v173_v20 = vrot.slane %v172_v16, 2  ;;  %v163_v21 = vrot.slane %v162_v17, 2  ;;  %v178_v22 = vadd.f32 %v177_v18, %v170_v14  ;;  %v399_v18 = vld [vmem:[%s814_s4 + $0x58] sm:$0xff] }
 0x105   :  { %v159_v23 = vrot.slane %v158_v19, 1  ;;  %v174_v24 = vadd.f32 %v173_v20, %v172_v16  ;;  %v164_v25 = vadd.f32 %v163_v21, %v162_v17  ;;  %v179_v26 = vrot.slane %v178_v22, 2  ;;  %v403_v16 = vld [vmem:[%s814_s4 + $0x78] sm:$0xff]  ;;  %v400_v17 = vld [vmem:[%s814_s4 + $0x60] sm:$0xff]  ;;  %v397_v20 = vld [vmem:[%s814_s4 + $0x48] sm:$0xff] }
 0x106   :  { %548 = vmatpush3.msra.mxu0 %v403_v16  ;;  %v396_v21 = vld [vmem:[%s814_s4 + $0x40] sm:$0xff] }
 0x107   :  { %v160_v27 = vadd.f32 %v159_v23, %v158_v19  ;;  %v175_v28 = vrot.slane %v174_v24, 1  ;;  %v165_v29 = vrot.slane %v164_v25, 1  ;;  %v180_v30 = vadd.f32 %v179_v26, %v178_v22  ;;  %549 = vmatprep.subr.mxu0 %v646_v0  ;;  %v398_v19 = vld [vmem:[%s814_s4 + $0x50] sm:$0xff]  ;;  %v395_v22 = vld [vmem:[%s814_s4 + $0x38] sm:$0xff] }
 0x108   :  { %v394_v23 = vld [vmem:[%s814_s4 + $0x30] sm:$0xff]  ;;  %v391_v26 = vld [vmem:[%s814_s4 + $0x18] sm:$0xff] }
 0x109   :  { %v167_v31 = vmul.f32 0.125, %v160_v27  ;;  %v176_v32 = vadd.f32 %v175_v28, %v174_v24  ;;  %v181_v33 = vrot.slane %v180_v30, 1  ;;  %v166_v34 = vadd.f32 %v165_v29, %v164_v25  ;;  %v393_v24 = vld [vmem:[%s814_s4 + $0x28] sm:$0xff]  ;;  %v392_v25 = vld [vmem:[%s814_s4 + $0x20] sm:$0xff]  ;;  %v390_v27 = vld [vmem:[%s814_s4 + $0x10] sm:$0xff] }
 0x10a   :  { %v389_v28 = vld [vmem:[%s814_s4 + $0x8] sm:$0xff]  ;;  %v388_v29 = vld [vmem:[%s814_s4] sm:$0xff] }
 0x10b   :  { %v183_v35 = vmul.f32 0.125, %v176_v32  ;;  %v185_v36 = vmul.f32 %v167_v31, %v167_v31  ;;  %v182_v37 = vadd.f32 %v181_v33, %v180_v30  ;;  %v168_v38 = vmul.f32 0.125, %v166_v34 }
 0x10d   :  { %v187_v39 = vsub.f32 %v183_v35, %v185_v36  ;;  %v184_v40 = vmul.f32 0.125, %v182_v37  ;;  %v186_v41 = vmul.f32 %v168_v38, %v168_v38 }
 0x10f   :  { %v189_v42 = vadd.f32 1e-05, %v187_v39  ;;  %v188_v43 = vsub.f32 %v184_v40, %v186_v41 }
 0x111   :  { %v190_v44 = vadd.f32 1e-05, %v188_v43  ;;  %591 = vrsqrt.f32 %v189_v42 }
 0x113   :  { %593 = vrsqrt.f32 %v190_v44 }
 0x11e   :  { %v592_v50 = vpop.eup %591 }
 0x120   :  { %v594_v52 = vpop.eup %593 }
 0x121   :  { %v195_v53 = vcombine.low %v592_v50, %v594_v52  ;;  %v41_v50 = vld [vmem:[%s811_s1 + $0x4] ss:$0 sm:$0xff] }
 0x123   :  { %v202_v54 = vrot.slane %v195_v53, %v201_v51  ;;  %v42_v53 = vld [vmem:[%s811_s1 + $0x5] ss:$0 sm:$0xff] }
 0x125   :  { %v209_v56 = vrot.slane %v202_v54, %v201_v51 }
 0x127   :  { %v211_v59 = vmul.f32 %v492_v55, %v209_v56 }
 0x129   :  { %v216_v60 = vrot.slane %v211_v59, %v215_v57  ;;  %v220_v61 = vrot.slane %v211_v59, %v219_v58  ;;  %v43_v59 = vld [vmem:[%s811_s1 + $0x6] ss:$0 sm:$0xff] }
 0x12b   :  { %v223_v62 = vmul.f32 %v216_v60, %v167_v31  ;;  %v224_v63 = vmul.f32 %v220_v61, %v168_v38  ;;  %v245_v6 = vmul.f32 %v220_v61, %v152_v10  ;;  %v244_v9 = vmul.f32 %v216_v60, %v721_v7  ;;  %v402_v10 = vld [vmem:[%s814_s4 + $0x70] sm:$0xff]  ;;  %v401_v7 = vld [vmem:[%s814_s4 + $0x68] sm:$0xff] }
 0x12c   :  { %550 = vmatpush3.msra.mxu0 %v402_v10 }
 0x12d   :  { %v227_v1 = vcombine.low %v223_v62, %v224_v63  ;;  %551 = vmatprep.subr.mxu0 %v646_v0 }
 0x12e   :  { %552 = vmatpush3.msra.mxu0 %v401_v7 }
 0x12f   :  { %v234_v2 = vrot.slane %v227_v1, %v201_v51  ;;  %553 = vmatprep.subr.mxu0 %v646_v0 }
 0x130   :  { %554 = vmatpush3.msra.mxu0 %v400_v17 }
 0x131   :  { %v241_v4 = vrot.slane %v234_v2, %v201_v51  ;;  %555 = vmatprep.subr.mxu0 %v646_v0 }
 0x132   :  { %556 = vmatpush3.msra.mxu0 %v399_v18 }
 0x133   :  { %v243_v5 = vsub.f32 %v493_v3, %v241_v4  ;;  %557 = vmatprep.subr.mxu0 %v646_v0 }
 0x134   :  { %558 = vmatpush3.msra.mxu0 %v398_v19 }
 0x135   :  { %v254_v8 = vrot.slane %v243_v5, %v219_v58  ;;  %v250_v11 = vrot.slane %v243_v5, %v215_v57  ;;  %559 = vmatprep.subr.mxu0 %v646_v0 }
 0x136   :  { %560 = vmatpush3.msra.mxu0 %v397_v20 }
 0x137   :  { %v258_v12 = vadd.f32 %v254_v8, %v245_v6  ;;  %v257_v13 = vadd.f32 %v250_v11, %v244_v9  ;;  %561 = vmatprep.subr.mxu0 %v646_v0 }
 0x138   :  { %562 = vmatpush3.msra.mxu0 %v396_v21 }
 0x139   :  { %v260_v14 = vmax.f32 %v258_v12, 0.0  ;;  %v259_v15 = vmax.f32 %v257_v13, 0.0  ;;  %563 = vmatprep.subr.mxu0 %v646_v0 }
 0x13a   :  { %564 = vmatpush3.msra.mxu0 %v395_v22 }
 0x13b   :  { %357 = vmatprep.mubr.f32.mxu1 %v260_v14  ;;  %565 = vmatprep.subr.mxu0 %v646_v0 }
 0x13c   :  { %358 = vmatmul.mubr.f32.vlgmr.msra.gmra.mxu1 %v259_v15  ;;  %566 = vmatpush3.msra.mxu0 %v394_v23 }
 0x13d   :  { %567 = vmatprep.subr.mxu0 %v646_v0 }
 0x13e   :  { %568 = vmatpush3.msra.mxu0 %v393_v24 }
 0x13f   :  { %569 = vmatprep.subr.mxu0 %v646_v0 }
 0x140   :  { %570 = vmatpush3.msra.mxu0 %v392_v25 }
 0x141   :  { %571 = vmatprep.subr.mxu0 %v646_v0 }
 0x142   :  { %572 = vmatpush3.msra.mxu0 %v391_v26 }
 0x143   :  { %573 = vmatprep.subr.mxu0 %v646_v0 }
 0x144   :  { %574 = vmatpush3.msra.mxu0 %v390_v27 }
 0x145   :  { %575 = vmatprep.subr.mxu0 %v646_v0 }
 0x146   :  { %576 = vmatpush3.msra.mxu0 %v389_v28 }
 0x147   :  { %577 = vmatprep.subr.mxu0 %v646_v0 }
 0x148   :  { %578 = vmatpush3.msra.mxu0 %v388_v29 }
 0x1fc   :  { %v527_v30 = vpop.f32.mrf.mxu1 }
 0x1fe   :  { %v528_v31 = vpop.f32.mrf.mxu1 }
 0x1ff   :  { %v529_v32 = vadd.f32 %v528_v31, %v527_v30 }
 0x201   :  { %v363_v33 = vrot.slane %v529_v32, 4  ;;  %v370_v34 = vmul.f32 %v529_v32, %v529_v32 }
 0x203   :  { %v364_v35 = vadd.f32 %v529_v32, %v363_v33  ;;  %v371_v36 = vrot.slane %v370_v34, 4 }
 0x205   :  { %v365_v37 = vrot.slane %v364_v35, 2  ;;  %v372_v38 = vadd.f32 %v371_v36, %v370_v34 }
 0x207   :  { %v366_v39 = vadd.f32 %v365_v37, %v364_v35  ;;  %v373_v40 = vrot.slane %v372_v38, 2 }
 0x209   :  { %v367_v41 = vrot.slane %v366_v39, 1  ;;  %v374_v42 = vadd.f32 %v373_v40, %v372_v38 }
 0x20b   :  { %v368_v43 = vadd.f32 %v367_v41, %v366_v39  ;;  %v375_v44 = vrot.slane %v374_v42, 1 }
 0x20d   :  { %v369_v45 = vmul.f32 0.125, %v368_v43  ;;  %v376_v46 = vadd.f32 %v375_v44, %v374_v42 }
 0x20f   :  { %v377_v47 = vmul.f32 0.125, %v376_v46  ;;  %v378_v0 = vmul.f32 %v369_v45, %v369_v45 }
 0x211   :  { %v379_v48 = vsub.f32 %v377_v47, %v378_v0 }
 0x213   :  { %v380_v49 = vadd.f32 1e-05, %v379_v48 }
 0x215   :  { %595 = vrsqrt.f32 %v380_v49 }
 0x222   :  { %v596_v51 = vpop.eup %595 }
 0x223   :  { %v382_v52 = vmul.f32 %v596_v51, %v41_v50 }
 0x225   :  { %v383_v54 = vmul.f32 %v382_v52, %v369_v45  ;;  %v385_v55 = vmul.f32 %v529_v32, %v382_v52 }
 0x227   :  { %v384_v56 = vsub.f32 %v42_v53, %v383_v54 }
 0x229   :  { %v386_v57 = vadd.f32 %v385_v55, %v384_v56 }
 0x22b   :  { %v387_v58 = vmax.f32 %v386_v57, 0.0 }
 0x22d   :  { %580 = vmatmul.mubr.f32.vlgmr.msra.gmra.mxu0 %v387_v58 }
 0x2ed   :  { %v470_v60 = vpop.f32.mrf.mxu0 }
 0x2ee   :  { %v471_v61 = vadd.f32 %v470_v60, %v43_v59 }
 0x2ef   :  { %v581_v62 = vpop.f32.mrf.mxu0 }
 0x2f0   :  { %597 = vtanh.f32 %v471_v61 }
 0x2fd   :  { %v598_v63 = vpop.eup %597 }
 0x2fe   :  { %476 = vst.msk [vmem:[#allocation5] sm:$0xff] %vm475_vm2, %v598_v63 }
 0x2ff   :  { %630 = shalt.err (!%p627_p9)
}
 0x300   :  { %486 = dma.vmem_to_hbm [thread:$0]  %s484_s7, 128, %s815_s5, [#allocation4]  }
 0x301   :  { %641 = dma.done.wait [#allocation4], 128  }
 0x302   :  { %642 = vsyncadd [#allocation4], 4294967168 }
 0x303   :  { %490 = vsyncpa [#allocation3], 1 }
 0x304   :  { %491 = vsyncpa [#allocation4], 1 }

</bundles_post_ra>
